<compile_context>
chip_gen: v7x
topology: tpu7x:2x2x1
jax: 0.10.0
libtpu: 0.0.40
codegen_flags: <defaults>
</compile_context>

<pallas_src>
import jax
import jax.numpy as jnp
from jax.experimental import pallas as pl
from jax.experimental.pallas import tpu as pltpu

_SUBLANE = 8


def _round_up(x, m):
    return (x + m - 1) // m * m


def bnn_forward_kernel(x_ref, w1_ref, b1_ref, w2_ref, b2_ref, w3_ref, b3_ref,
                       o_ref):
    # Layer 1: Linear(input_dim -> 32) + ReLU
    h = jnp.dot(x_ref[...], w1_ref[...],
                preferred_element_type=jnp.float32) + b1_ref[...]
    h = jnp.maximum(h, 0.0)
    # Layer 2: Linear(32 -> 16) + ReLU
    h = jnp.dot(h, w2_ref[...],
                preferred_element_type=jnp.float32) + b2_ref[...]
    h = jnp.maximum(h, 0.0)
    # Layer 3: Linear(16 -> out_dim) + Sigmoid (narrow, real columns only)
    h = jnp.dot(h, w3_ref[...],
                preferred_element_type=jnp.float32) + b3_ref[...]
    o_ref[...] = jax.nn.sigmoid(h).astype(o_ref.dtype)


def bnn_forward(x, params, *, max_block_rows=4096):
    """x: [B, input_dim] f32; params: dict of sampled weights/biases."""
    w1, b1 = params["w1"], params["b1"]
    w2, b2 = params["w2"], params["b2"]
    w3, b3 = params["w3"], params["b3"]
    B, in_dim = x.shape
    out_dim = w3.shape[1]

    # --- Batch handling: pad only to the sublane multiple (8) if needed ---
    B8 = _round_up(B, _SUBLANE)
    x_p = x if B8 == B else jnp.pad(x, ((0, B8 - B), (0, 0)))

    # --- Batch tile: multiple of 8, capped at the (sublane-padded) batch ---
    TB = max(_SUBLANE, _round_up(min(int(max_block_rows), B8), _SUBLANE))
    # v7x megacore: keep >= 2 grid steps when the batch allows it so the
    # "parallel" batch axis can be sharded across both TensorCores.
    if pl.cdiv(B8, TB) < 2 and B8 >= 2 * _SUBLANE:
        TB = _round_up(pl.cdiv(B8, 2), _SUBLANE)

    grid = (pl.cdiv(B8, TB),)  # ragged last tile is fine (masked by Pallas)

    def resident(arr):
        # Tiny weight/bias tensors: full-array block, same block every step
        # -> stays VMEM-resident across the whole grid.
        nd = arr.ndim
        return pl.BlockSpec(arr.shape, lambda i: (0,) * nd)

    flops = 2 * B8 * (in_dim * 32 + 32 * 16 + 16 * out_dim)
    bytes_accessed = 4 * (x_p.size + B8 * out_dim
                          + w1.size + b1.size + w2.size + b2.size
                          + w3.size + b3.size)

    y_pad = pl.pallas_call(
        bnn_forward_kernel,
        out_shape=jax.ShapeDtypeStruct((B8, out_dim), jnp.float32),
        grid=grid,
        in_specs=[
            pl.BlockSpec((TB, in_dim), lambda i: (i, 0)),   # batch-tiled x
            resident(w1), resident(b1),
            resident(w2), resident(b2),
            resident(w3), resident(b3),
        ],
        out_specs=pl.BlockSpec((TB, out_dim), lambda i: (i, 0)),
        compiler_params=pltpu.CompilerParams(
            dimension_semantics=("parallel",)),
        cost_estimate=pl.CostEstimate(
            flops=flops,
            transcendentals=B8 * out_dim,
            bytes_accessed=bytes_accessed),
    )(x_p, w1, b1, w2, b2, w3, b3)

    return y_pad[:B]


def sample_bayes_linear_params(key, in_features, out_features,
                               prior_mu=0.0, prior_sigma=0.1):
    """Deterministic reparameterized sample of one BayesLinear layer.

    weight_mu ~ small normal init, weight_log_sigma = log(prior_sigma)
    W = weight_mu + exp(weight_log_sigma) * eps   (torchbnn semantics)
    Returned W is [in_features, out_features] (pre-transposed), b is [1, out].
    """
    k_mu_w, k_mu_b, k_eps_w, k_eps_b = jax.random.split(key, 4)
    std = 1.0 / jnp.sqrt(jnp.float32(in_features))
    weight_mu = prior_mu + std * jax.random.normal(
        k_mu_w, (out_features, in_features), jnp.float32)
    bias_mu = prior_mu + std * jax.random.normal(
        k_mu_b, (out_features,), jnp.float32)
    log_sigma = jnp.log(jnp.float32(prior_sigma))
    eps_w = jax.random.normal(k_eps_w, (out_features, in_features), jnp.float32)
    eps_b = jax.random.normal(k_eps_b, (out_features,), jnp.float32)
    W = weight_mu + jnp.exp(log_sigma) * eps_w          # [out, in]
    b = bias_mu + jnp.exp(log_sigma) * eps_b            # [out]
    return W.T, b.reshape(1, out_features)              # [in, out], [1, out]


def make_bnn_params(key, input_dim, output_dim, prior_mu=0.0, prior_sigma=0.1):
    k1, k2, k3 = jax.random.split(key, 3)
    w1, b1 = sample_bayes_linear_params(k1, input_dim, 32, prior_mu, prior_sigma)
    w2, b2 = sample_bayes_linear_params(k2, 32, 16, prior_mu, prior_sigma)
    w3, b3 = sample_bayes_linear_params(k3, 16, output_dim, prior_mu, prior_sigma)
    return {"w1": w1, "b1": b1, "w2": w2, "b2": b2, "w3": w3, "b3": b3}


if __name__ == "__main__":
    key = jax.random.PRNGKey(0)
    k_x, k_p = jax.random.split(key)

    batch, input_dim, output_dim = 8, 8, 4
    x = jax.random.normal(k_x, (batch, input_dim), jnp.float32)
    params = make_bnn_params(k_p, input_dim, output_dim,
                             prior_mu=0.0, prior_sigma=0.1)

    y = bnn_forward(x, params)
    jax.block_until_ready(y)

    # Reference check in plain JAX (same math, same sampled params).
    h = jnp.maximum(x @ params["w1"] + params["b1"], 0.0)
    h = jnp.maximum(h @ params["w2"] + params["b2"], 0.0)
    y_ref = jax.nn.sigmoid(h @ params["w3"] + params["b3"])
    assert y.shape == (batch, output_dim)
    assert jnp.allclose(y, y_ref, atol=1e-5, rtol=1e-5)

    print("KERNEL_OK")
</pallas_src>

<mosaic_0001>
module attributes {stable_mosaic.version = 11 : i64} {
  func.func @bnn_forward_kernel(%arg0: i32, %arg1: memref<8x8xf32, #tpu.memory_space<vmem>>, %arg2: memref<8x32xf32, #tpu.memory_space<vmem>>, %arg3: memref<1x32xf32, #tpu.memory_space<vmem>>, %arg4: memref<32x16xf32, #tpu.memory_space<vmem>>, %arg5: memref<1x16xf32, #tpu.memory_space<vmem>>, %arg6: memref<16x4xf32, #tpu.memory_space<vmem>>, %arg7: memref<1x4xf32, #tpu.memory_space<vmem>>, %arg8: memref<8x4xf32, #tpu.memory_space<vmem>>) attributes {dimension_semantics = [#tpu.dimension_semantics<parallel>], iteration_bounds = array<i64: 1>, scalar_prefetch = 0 : i64, scratch_operands = 0 : i64, tpu.core_type = #tpu.core_type<tc>, window_params = [{transform_indices = @transform_0, window_bounds = array<i64: 8, 8>}, {pipeline_mode = #tpu.pipeline_mode<synchronous>, transform_indices = @transform_1, window_bounds = array<i64: 8, 32>}, {pipeline_mode = #tpu.pipeline_mode<synchronous>, transform_indices = @transform_2, window_bounds = array<i64: 1, 32>}, {pipeline_mode = #tpu.pipeline_mode<synchronous>, transform_indices = @transform_3, window_bounds = array<i64: 32, 16>}, {pipeline_mode = #tpu.pipeline_mode<synchronous>, transform_indices = @transform_4, window_bounds = array<i64: 1, 16>}, {pipeline_mode = #tpu.pipeline_mode<synchronous>, transform_indices = @transform_5, window_bounds = array<i64: 16, 4>}, {pipeline_mode = #tpu.pipeline_mode<synchronous>, transform_indices = @transform_6, window_bounds = array<i64: 1, 4>}, {transform_indices = @transform_7, window_bounds = array<i64: 8, 4>}]} {
    %c0 = arith.constant 0 : index
    %c0_0 = arith.constant 0 : index
    %0 = vector.load %arg1[%c0, %c0_0] : memref<8x8xf32, #tpu.memory_space<vmem>>, vector<8x8xf32>
    %c0_1 = arith.constant 0 : index
    %c0_2 = arith.constant 0 : index
    %1 = vector.load %arg2[%c0_1, %c0_2] : memref<8x32xf32, #tpu.memory_space<vmem>>, vector<8x32xf32>
    %cst = arith.constant dense<0.000000e+00> : vector<8x32xf32>
    %2 = tpu.matmul %0, %1, %cst {dimension_numbers = #tpu.dot_dimension_numbers<[1], [0], [0], [1], [0, 0, 1, 1], [], []>} : vector<8x8xf32>, vector<8x32xf32>, vector<8x32xf32> -> vector<8x32xf32>
    %c0_3 = arith.constant 0 : index
    %c0_4 = arith.constant 0 : index
    %3 = vector.load %arg3[%c0_3, %c0_4] : memref<1x32xf32, #tpu.memory_space<vmem>>, vector<1x32xf32>
    %4 = vector.broadcast %3 : vector<1x32xf32> to vector<8x32xf32>
    %5 = arith.addf %2, %4 : vector<8x32xf32>
    %cst_5 = arith.constant 0.000000e+00 : f32
    %6 = vector.broadcast %cst_5 : f32 to vector<8x32xf32>
    %7 = arith.maximumf %5, %6 : vector<8x32xf32>
    %c0_6 = arith.constant 0 : index
    %c0_7 = arith.constant 0 : index
    %8 = vector.load %arg4[%c0_6, %c0_7] : memref<32x16xf32, #tpu.memory_space<vmem>>, vector<32x16xf32>
    %cst_8 = arith.constant dense<0.000000e+00> : vector<8x16xf32>
    %9 = tpu.matmul %7, %8, %cst_8 {dimension_numbers = #tpu.dot_dimension_numbers<[1], [0], [0], [1], [0, 0, 1, 1], [], []>} : vector<8x32xf32>, vector<32x16xf32>, vector<8x16xf32> -> vector<8x16xf32>
    %c0_9 = arith.constant 0 : index
    %c0_10 = arith.constant 0 : index
    %10 = vector.load %arg5[%c0_9, %c0_10] : memref<1x16xf32, #tpu.memory_space<vmem>>, vector<1x16xf32>
    %11 = vector.broadcast %10 : vector<1x16xf32> to vector<8x16xf32>
    %12 = arith.addf %9, %11 : vector<8x16xf32>
    %cst_11 = arith.constant 0.000000e+00 : f32
    %13 = vector.broadcast %cst_11 : f32 to vector<8x16xf32>
    %14 = arith.maximumf %12, %13 : vector<8x16xf32>
    %c0_12 = arith.constant 0 : index
    %c0_13 = arith.constant 0 : index
    %15 = vector.load %arg6[%c0_12, %c0_13] : memref<16x4xf32, #tpu.memory_space<vmem>>, vector<16x4xf32>
    %cst_14 = arith.constant dense<0.000000e+00> : vector<8x4xf32>
    %16 = tpu.matmul %14, %15, %cst_14 {dimension_numbers = #tpu.dot_dimension_numbers<[1], [0], [0], [1], [0, 0, 1, 1], [], []>} : vector<8x16xf32>, vector<16x4xf32>, vector<8x4xf32> -> vector<8x4xf32>
    %c0_15 = arith.constant 0 : index
    %c0_16 = arith.constant 0 : index
    %17 = vector.load %arg7[%c0_15, %c0_16] : memref<1x4xf32, #tpu.memory_space<vmem>>, vector<1x4xf32>
    %18 = vector.broadcast %17 : vector<1x4xf32> to vector<8x4xf32>
    %19 = arith.addf %16, %18 : vector<8x4xf32>
    %20 = arith.negf %19 : vector<8x4xf32>
    %21 = math.exp %20 : vector<8x4xf32>
    %cst_17 = arith.constant 1.000000e+00 : f32
    %22 = vector.broadcast %cst_17 : f32 to vector<8x4xf32>
    %23 = arith.addf %22, %21 : vector<8x4xf32>
    %24 = arith.divf %22, %23 : vector<8x4xf32>
    %c0_18 = arith.constant 0 : index
    %c0_19 = arith.constant 0 : index
    %25 = vector.load %arg8[%c0_18, %c0_19] : memref<8x4xf32, #tpu.memory_space<vmem>>, vector<8x4xf32>
    tpu.vector_store %arg8[%c0_18, %c0_19], %24 {strides = array<i32>} : memref<8x4xf32, #tpu.memory_space<vmem>>, vector<8x4xf32>,
    return
  }
  func.func @transform_0(%arg0: i32) -> (i32, i32) {
    %c0_i32 = arith.constant 0 : i32
    %c0_i32_0 = arith.constant 0 : i32
    return %arg0, %c0_i32 : i32, i32
  }
  func.func @transform_1(%arg0: i32) -> (i32, i32) {
    %c0_i32 = arith.constant 0 : i32
    %c0_i32_0 = arith.constant 0 : i32
    %c0_i32_1 = arith.constant 0 : i32
    return %c0_i32, %c0_i32_0 : i32, i32
  }
  func.func @transform_2(%arg0: i32) -> (i32, i32) {
    %c0_i32 = arith.constant 0 : i32
    %c0_i32_0 = arith.constant 0 : i32
    %c0_i32_1 = arith.constant 0 : i32
    return %c0_i32, %c0_i32_0 : i32, i32
  }
  func.func @transform_3(%arg0: i32) -> (i32, i32) {
    %c0_i32 = arith.constant 0 : i32
    %c0_i32_0 = arith.constant 0 : i32
    %c0_i32_1 = arith.constant 0 : i32
    return %c0_i32, %c0_i32_0 : i32, i32
  }
  func.func @transform_4(%arg0: i32) -> (i32, i32) {
    %c0_i32 = arith.constant 0 : i32
    %c0_i32_0 = arith.constant 0 : i32
    %c0_i32_1 = arith.constant 0 : i32
    return %c0_i32, %c0_i32_0 : i32, i32
  }
  func.func @transform_5(%arg0: i32) -> (i32, i32) {
    %c0_i32 = arith.constant 0 : i32
    %c0_i32_0 = arith.constant 0 : i32
    %c0_i32_1 = arith.constant 0 : i32
    return %c0_i32, %c0_i32_0 : i32, i32
  }
  func.func @transform_6(%arg0: i32) -> (i32, i32) {
    %c0_i32 = arith.constant 0 : i32
    %c0_i32_0 = arith.constant 0 : i32
    %c0_i32_1 = arith.constant 0 : i32
    return %c0_i32, %c0_i32_0 : i32, i32
  }
  func.func @transform_7(%arg0: i32) -> (i32, i32) {
    %c0_i32 = arith.constant 0 : i32
    %c0_i32_0 = arith.constant 0 : i32
    return %arg0, %c0_i32 : i32, i32
  }
}

</mosaic_0001>

<bundles_post_ra>
// kernel: tpu_custom_call.1
= control target key start
LH: loop header
LB: loop body
LE: loop exit
PB: predicated region body
PF: predicated region fallthrough
CT: control target
= control target key end

     0   :  { %vm35_vm0 = vcmask 64512   ;;  %v347_v0 = vmov 0.0   ;;  %vm348_vm1 = vmmov 0   ;;  %v349_v4 = vmov 0.0|0.0   ;;  %s426_s1 = inlined_call_operand.vmem [shape: f32[8,32], index: 1, kind: input, shape index: {}]   ;;  %s427_s0 = inlined_call_operand.vmem [shape: f32[8,8], index: 0, kind: input, shape index: {}]   ;;  %s428_s3 = inlined_call_operand.vmem [shape: f32[32,16], index: 3, kind: input, shape index: {}]   ;;  %s429_s2 = inlined_call_operand.vmem [shape: f32[1,32], index: 2, kind: input, shape index: {}]   ;;  %s430_s5 = inlined_call_operand.vmem [shape: f32[16,4], index: 5, kind: input, shape index: {}]   ;;  %s431_s4 = inlined_call_operand.vmem [shape: f32[1,16], index: 4, kind: input, shape index: {}]   ;;  %s432_s6 = inlined_call_operand.vmem [shape: f32[1,4], index: 6, kind: input, shape index: {}]   ;;  %s433_s7 = inlined_call_operand.vmem [shape: f32[8,4], index: 7, kind: output, shape index: {}]  }
   0x1   :  { %308 = vmatprep.subr.mxu0 %v347_v0  ;;  %v27_v1 = vld [vmem:[%s426_s1] sm:$0xff]  ;;  %310 = vmatprep.mubr.msk.f32.mxu0 %vm348_vm1, %v347_v0  ;;  %v111_v5 = vld [vmem:[%s428_s3 + $0x8] sm:$0xff]  ;;  %v112_v7 = vld [vmem:[%s428_s3 + $0x10] sm:$0xff]  ;;  %vm121_vm2 = vcmask 261120   ;;  %vm205_vm3 = vcmask 130048   ;;  %vm285_vm4 = vcmask 31744  }
   0x2   :  { %v26_v2 = vld [vmem:[%s427_s0] sm:$0xff]  ;;  %309 = vmatpush3.msra.mxu0 %v27_v1  ;;  %331 = vmatprep.subr.bf16.mxu1 %v349_v4  ;;  %v113_v8 = vld [vmem:[%s428_s3 + $0x18] sm:$0xff]  ;;  %v197_v16 = vld [vmem:[%s430_s5 + $0x8] sm:$0xff] }
   0x3   :  { %v110_v3 = vld [vmem:[%s428_s3] sm:$0xff]  ;;  %311 = vmatmul.mubr.msk.f32.vlgmr.msra.gmra.mrb[0].mxu0 %vm35_vm0, %v26_v2  ;;  %321 = vmatprep.mubr.msk.f32.mxu1 %vm348_vm1, %v347_v0  ;;  %v335_v9 = vpack.c.bf16 %v113_v8, %v112_v7 }
   0x4   :  { %v332_v6 = vpack.c.bf16 %v111_v5, %v110_v3  ;;  %337 = vmatprep.subr.bf16.mxu0 %v349_v4  ;;  %328 = vmatprep.mubr.msk.f32.mxu0 %vm348_vm1, %v347_v0  ;;  %v291_v10 = vld [vmem:[%s429_s2] ss:$0 sm:$0xff] }
   0x5   :  { %v196_v15 = vld [vmem:[%s430_s5] sm:$0xff] }
   0x6   :  { %333 = vmatpush3.bf16.msra.mxu1 %v332_v6  ;;  %v338_v17 = vpack.c.bf16 %v197_v16, %v196_v15  ;;  %v293_v18 = vld [vmem:[%s431_s4] ss:$0 sm:$0xff] }
   0x7   :  { %334 = vmatprep.subr.bf16.mxu1 %v349_v4  ;;  %v295_v23 = vld [vmem:[%s432_s6] ss:$0 sm:$0xff] }
   0x8   :  { %339 = vmatpush3.bf16.msra.mxu0 %v338_v17 }
   0xa   :  { %336 = vmatpush3.bf16.msra.mxu1 %v335_v9 }
  0xd6   :  { %v105_v11 = vpop.f32.mrb[0].mxu0 }
  0xd7   :  { %v106_v12 = vadd.f32 %v291_v10, %v105_v11  ;;  %v312_v13 = vpop.f32.mrb[1].mxu0 }
  0xd9   :  { %v109_v14 = vmax.f32 %v106_v12, 0.0 }
  0xdb   :  { %322 = vmatmul.mubr.msk.f32.vlgmr.msra.gmra.mrb[0].mxu1 %vm121_vm2, %v109_v14 }
 0x1ae   :  { %v191_v19 = vpop.f32.mrb[0].mxu1 }
 0x1af   :  { %v192_v20 = vadd.f32 %v293_v18, %v191_v19  ;;  %v323_v21 = vpop.f32.mrb[1].mxu1 }
 0x1b1   :  { %v195_v22 = vmax.f32 %v192_v20, 0.0 }
 0x1b3   :  { %329 = vmatmul.mubr.msk.f32.vlgmr.msra.gmra.mrb[2].mxu0 %vm205_vm3, %v195_v22 }
 0x286   :  { %v275_v24 = vpop.f32.mrb[2].mxu0 }
 0x287   :  { %v276_v25 = vadd.f32 %v295_v23, %v275_v24  ;;  %v330_v26 = vpop.f32.mrb[3].mxu0 }
 0x289   :  { %v297_v27 = vmul.f32 -1.442695, %v276_v25 }
 0x28b   :  { %343 = vpow2.f32 %v297_v27 }
 0x295   :  { %v344_v28 = vpop.eup %343 }
 0x296   :  { %v282_v29 = vadd.f32 1.0, %v344_v28 }
 0x298   :  { %345 = vrcp.f32 %v282_v29 }
 0x2a2   :  { %v346_v30 = vpop.eup %345 }
 0x2a3   :  { %286 = vst.msk [vmem:[%s433_s7] sm:$0xff] %vm285_vm4, %v346_v30 }

</bundles_post_ra>
